<compile_context>
chip_gen: v6e
topology: v6e:2x2x1
jax: 0.10.0
libtpu: 0.0.40
codegen_flags: <defaults>
</compile_context>

<pallas_src>
import functools

import numpy as np
import jax
import jax.numpy as jnp
from jax import lax
from jax.experimental import pallas as pl
from jax.experimental.pallas import tpu as pltpu

BN_EPS = 1e-5


# ---------------------------------------------------------------------------
# Kernel A: fused conv1x1 -> conv3x3 (+bias) -> per-image BN partial stats
# ---------------------------------------------------------------------------
def _fused_conv_stats_kernel(x_ref, w1_ref, b1_ref, w2_ref, b2_ref, cm_ref,
                             y_ref, st_ref, p_ref, *, H, W, C, C2):
    """One image per grid step.  Pixels on lanes, channels on sublanes.

    x_ref  : (1, C, HW)   input image (input dtype)
    w1_ref : (C2, C)      1x1 conv weight, bf16
    b1_ref : (C2, 1)      f32
    w2_ref : (C, 9*C2)    3x3 conv weight, tap-major columns, bf16
    b2_ref : (C, 1)       f32
    cm_ref : (2, HW)      f32 column masks: [col > 0, col < W-1]
    y_ref  : (1, C, HW)   pre-BN conv2 output, bf16
    st_ref : (1, C, 2)    per-image [sum(y), sum(y*y)] over pixels, f32
    p_ref  : (9*C2, HW)   f32 VMEM scratch: im2col patch matrix
    """
    HW = H * W

    # ---- 1x1 conv on the MXU (bf16 x bf16 -> f32 accumulation) -------------
    xb = x_ref[0].astype(jnp.bfloat16)                            # (C, HW)
    a = (jnp.dot(w1_ref[...], xb, preferred_element_type=jnp.float32)
         + b1_ref[...])                                           # (C2, HW) f32

    # ---- edge masks emulating the 3x3 conv's zero padding -------------------
    # Row masks need only flat-index comparisons (no integer div in-kernel);
    # column masks (need p % W) come from a tiny constant HBM stream.
    pix = lax.broadcasted_iota(jnp.int32, (1, HW), 1)
    row_masks = [(pix >= W).astype(jnp.float32),                  # ky == 0
                 None,                                            # ky == 1
                 (pix < (H - 1) * W).astype(jnp.float32)]         # ky == 2
    col_masks = [cm_ref[0:1, :], None, cm_ref[1:2, :]]            # kx = 0,1,2

    # ---- build the (9*C2, HW) im2col patch matrix with XLU lane rolls -------
    for ky in range(3):
        for kx in range(3):
            t = ky * 3 + kx
            # want patch[:, p] = a[:, p + (ky-1)*W + (kx-1)]  (np.roll sems)
            shift = ((1 - ky) * W + (1 - kx)) % HW
            patch = pltpu.roll(a, shift, 1) if shift else a
            mask = row_masks[ky]
            if col_masks[kx] is not None:
                mask = col_masks[kx] if mask is None else mask * col_masks[kx]
            if mask is not None:
                patch = patch * mask
            p_ref[pl.ds(t * C2, C2), :] = patch

    # ---- 3x3 conv as a single (C, 9*C2) @ (9*C2, HW) bf16 MXU matmul --------
    acc = (jnp.dot(w2_ref[...], p_ref[...].astype(jnp.bfloat16),
                   preferred_element_type=jnp.float32)
           + b2_ref[...])                                         # (C, HW) f32

    # ---- per-image BatchNorm partial statistics (f32, before bf16 cast) -----
    st_ref[0, :, 0:1] = jnp.sum(acc, axis=-1, keepdims=True)
    st_ref[0, :, 1:2] = jnp.sum(acc * acc, axis=-1, keepdims=True)

    y_ref[0] = acc.astype(y_ref.dtype)


# ---------------------------------------------------------------------------
# Kernel B: BN normalize + sigmoid + multiply (lane-dense, HW-tiled)
# ---------------------------------------------------------------------------
def _bn_sigmoid_mul_kernel(y_ref, x_ref, scale_ref, shift_ref, o_ref):
    # Widen bf16 -> f32 immediately (v5e VPU has no bf16 elementwise support).
    att = jax.nn.sigmoid(y_ref[0].astype(jnp.float32) * scale_ref[...]
                         + shift_ref[...])
    o_ref[0] = (x_ref[0].astype(jnp.float32) * att).astype(o_ref.dtype)


# ---------------------------------------------------------------------------
# Helpers
# ---------------------------------------------------------------------------
def _vmem_limit(block_bytes):
    """Scoped-VMEM request: generous, but never above physical capacity."""
    cap = 64 * 1024 * 1024                      # conservative fallback (v7x)
    try:
        cap = int(pltpu.get_tpu_info().vmem_capacity_bytes)
    except Exception:
        pass
    cap = cap * 3 // 4                          # leave compiler headroom
    want = max(32 * 1024 * 1024, 2 * int(block_bytes))
    return int(min(want, cap))


def _pick_hw_tile(HW, C, budget_bytes=2 * 1024 * 1024):
    """Largest lane tile (multiple of 128, divisor of HW) within a byte budget."""
    if HW % 128 != 0:
        return HW                               # full extent is always legal
    t = min(HW, max(128, (budget_bytes // (4 * C)) // 128 * 128))
    while t > 128 and HW % t != 0:
        t -= 128
    return t if HW % t == 0 else HW


# ---------------------------------------------------------------------------
# Wrapper
# ---------------------------------------------------------------------------
def ema_forward(x_nchw, params):
    w1, b1, w2, b2, gamma, beta = params
    N, C, H, W = x_nchw.shape
    C2 = C // 2
    HW = H * W
    xbytes = jnp.dtype(x_nchw.dtype).itemsize

    # Free metadata reshape — no NCHW<->NHWC transposes anywhere.
    x3 = x_nchw.reshape(N, C, HW)

    # Weights rearranged for weight-stationary (out, in) @ (in, pixels) matmuls.
    w1m = w1[:, :, 0, 0].astype(jnp.bfloat16)                         # (C2, C)
    w2m = (jnp.transpose(w2, (0, 2, 3, 1))                            # (C,3,3,C2)
           .reshape(C, 9 * C2).astype(jnp.bfloat16))                  # tap-major
    b1r = b1.reshape(C2, 1).astype(jnp.float32)
    b2r = b2.reshape(C, 1).astype(jnp.float32)

    # Column masks for the 3x3 zero padding along W (tiny constant stream;
    # row masks are built in-kernel from a lane iota).
    col = jnp.arange(HW, dtype=jnp.int32) % W
    cmask = jnp.stack([col > 0, col < W - 1], axis=0).astype(jnp.float32)

    # --- kernel A: fused conv1x1 + conv3x3 + per-image BN stats --------------
    blk_a = C * HW * (2 * xbytes + 2 * 2) + 9 * C2 * HW * 4 + 4096
    flops_a = 2 * N * HW * (C2 * C + 9 * C2 * C)
    bytes_a = N * C * HW * (xbytes + 2) + 4 * (10 * C * C2 + 2 * HW + 3 * C)

    y3, stats = pl.pallas_call(
        functools.partial(_fused_conv_stats_kernel, H=H, W=W, C=C, C2=C2),
        out_shape=(jax.ShapeDtypeStruct((N, C, HW), jnp.bfloat16),
                   jax.ShapeDtypeStruct((N, C, 2), jnp.float32)),
        grid=(N,),
        in_specs=[
            pl.BlockSpec((1, C, HW), lambda n: (n, 0, 0)),
            pl.BlockSpec((C2, C), lambda n: (0, 0)),
            pl.BlockSpec((C2, 1), lambda n: (0, 0)),
            pl.BlockSpec((C, 9 * C2), lambda n: (0, 0)),
            pl.BlockSpec((C, 1), lambda n: (0, 0)),
            pl.BlockSpec((2, HW), lambda n: (0, 0)),
        ],
        out_specs=(
            pl.BlockSpec((1, C, HW), lambda n: (n, 0, 0)),
            pl.BlockSpec((1, C, 2), lambda n: (n, 0, 0)),
        ),
        scratch_shapes=[pltpu.VMEM((9 * C2, HW), jnp.float32)],
        compiler_params=pltpu.CompilerParams(
            dimension_semantics=("parallel",),
            vmem_limit_bytes=_vmem_limit(blk_a)),
        cost_estimate=pl.CostEstimate(flops=flops_a, transcendentals=0,
                                      bytes_accessed=bytes_a),
    )(x3, w1m, b1r, w2m, b2r, cmask)

    # --- tiny BN reduction + scale/shift folding (plain JAX) -----------------
    denom = float(N * HW)
    mean = jnp.sum(stats[:, :, 0], axis=0) / denom                    # (C,)
    var = jnp.maximum(jnp.sum(stats[:, :, 1], axis=0) / denom - mean * mean, 0.0)
    scale = gamma.astype(jnp.float32) * lax.rsqrt(var + BN_EPS)
    shift = beta.astype(jnp.float32) - mean * scale
    scale_c = scale.reshape(C, 1)
    shift_c = shift.reshape(C, 1)

    # --- kernel B: normalize + sigmoid + multiply, lane-dense HW tiles -------
    hw_t = _pick_hw_tile(HW, C)
    blk_b = 2 * C * hw_t * (2 + 2 * xbytes)
    # NOTE: pipeline_mode=pl.Buffered(3) on y/x is a further option if a trace
    #       shows exposed DMA at step boundaries; default double-buffering kept.
    out3 = pl.pallas_call(
        _bn_sigmoid_mul_kernel,
        out_shape=jax.ShapeDtypeStruct((N, C, HW), x_nchw.dtype),
        grid=(N, HW // hw_t),
        in_specs=[
            pl.BlockSpec((1, C, hw_t), lambda n, j: (n, 0, j)),
            pl.BlockSpec((1, C, hw_t), lambda n, j: (n, 0, j)),
            pl.BlockSpec((C, 1), lambda n, j: (0, 0)),
            pl.BlockSpec((C, 1), lambda n, j: (0, 0)),
        ],
        out_specs=pl.BlockSpec((1, C, hw_t), lambda n, j: (n, 0, j)),
        compiler_params=pltpu.CompilerParams(
            dimension_semantics=("parallel", "parallel"),
            vmem_limit_bytes=_vmem_limit(blk_b)),
        cost_estimate=pl.CostEstimate(
            flops=3 * N * C * HW, transcendentals=N * C * HW,
            bytes_accessed=N * C * HW * (2 + 2 * xbytes) + 8 * C),
    )(y3, x3, scale_c, shift_c)

    return out3.reshape(N, C, H, W)


# ---------------------------------------------------------------------------
# Pure-JAX reference (for correctness check)
# ---------------------------------------------------------------------------
def ema_reference(x_nchw, params):
    w1, b1, w2, b2, gamma, beta = params
    x = jnp.transpose(x_nchw, (0, 2, 3, 1)).astype(jnp.float32)
    dn = ("NHWC", "HWIO", "NHWC")
    a = lax.conv_general_dilated(
        x, jnp.transpose(w1, (2, 3, 1, 0)), (1, 1), "VALID",
        dimension_numbers=dn, precision=lax.Precision.HIGHEST) + b1
    y = lax.conv_general_dilated(
        a, jnp.transpose(w2, (2, 3, 1, 0)), (1, 1), "SAME",
        dimension_numbers=dn, precision=lax.Precision.HIGHEST) + b2
    mean = jnp.mean(y, axis=(0, 1, 2), keepdims=True)
    var = jnp.mean((y - mean) ** 2, axis=(0, 1, 2), keepdims=True)
    y = (y - mean) * lax.rsqrt(var + BN_EPS) * gamma + beta
    att = jax.nn.sigmoid(y)
    return jnp.transpose(x * att, (0, 3, 1, 2)).astype(x_nchw.dtype)


# ---------------------------------------------------------------------------
if __name__ == "__main__":
    N, C, H, W = 2, 16, 16, 16
    C2 = C // 2

    key = jax.random.PRNGKey(0)
    k1, k2, k3, k4, k5, k6, kx = jax.random.split(key, 7)

    # Deterministic synthetic parameters (shapes from EMA.__init__)
    w1 = jax.random.normal(k1, (C2, C, 1, 1), jnp.float32) / jnp.sqrt(C)
    b1 = 0.1 * jax.random.normal(k2, (C2,), jnp.float32)
    w2 = jax.random.normal(k3, (C, C2, 3, 3), jnp.float32) / jnp.sqrt(9 * C2)
    b2 = 0.1 * jax.random.normal(k4, (C,), jnp.float32)
    gamma = 1.0 + 0.1 * jax.random.normal(k5, (C,), jnp.float32)
    beta = 0.1 * jax.random.normal(k6, (C,), jnp.float32)
    params = (w1, b1, w2, b2, gamma, beta)

    x = jax.random.normal(kx, (N, C, H, W), jnp.float32)

    out = jax.block_until_ready(ema_forward(x, params))
    ref = jax.block_until_ready(ema_reference(x, params))

    assert out.shape == x.shape and out.dtype == x.dtype
    err = float(jnp.max(jnp.abs(out - ref)))
    # bf16 MXU matmuls + bf16 intermediate vs f32 reference -> relaxed abs tol
    assert np.isfinite(err) and err < 5e-2, f"max abs err {err}"
    print("KERNEL_OK")
</pallas_src>

<mosaic_0001>
module attributes {stable_mosaic.version = 11 : i64} {
  func.func @_fused_conv_stats_kernel(%arg0: i32, %arg1: memref<1x16x256xf32, #tpu.memory_space<vmem>>, %arg2: memref<8x16xbf16, #tpu.memory_space<vmem>>, %arg3: memref<8x1xf32, #tpu.memory_space<vmem>>, %arg4: memref<16x72xbf16, #tpu.memory_space<vmem>>, %arg5: memref<16x1xf32, #tpu.memory_space<vmem>>, %arg6: memref<2x256xf32, #tpu.memory_space<vmem>>, %arg7: memref<1x16x256xbf16, #tpu.memory_space<vmem>>, %arg8: memref<1x16x2xf32, #tpu.memory_space<vmem>>, %arg9: memref<72x256xf32, #tpu.memory_space<vmem>>) attributes {dimension_semantics = [#tpu.dimension_semantics<parallel>], iteration_bounds = array<i64: 2>, scalar_prefetch = 0 : i64, scratch_operands = 1 : i64, tpu.core_type = #tpu.core_type<tc>, window_params = [{transform_indices = @transform_0, window_bounds = array<i64: 1, 16, 256>}, {pipeline_mode = #tpu.pipeline_mode<synchronous>, transform_indices = @transform_1, window_bounds = array<i64: 8, 16>}, {pipeline_mode = #tpu.pipeline_mode<synchronous>, transform_indices = @transform_2, window_bounds = array<i64: 8, 1>}, {pipeline_mode = #tpu.pipeline_mode<synchronous>, transform_indices = @transform_3, window_bounds = array<i64: 16, 72>}, {pipeline_mode = #tpu.pipeline_mode<synchronous>, transform_indices = @transform_4, window_bounds = array<i64: 16, 1>}, {pipeline_mode = #tpu.pipeline_mode<synchronous>, transform_indices = @transform_5, window_bounds = array<i64: 2, 256>}, {transform_indices = @transform_6, window_bounds = array<i64: 1, 16, 256>}, {transform_indices = @transform_7, window_bounds = array<i64: 1, 16, 2>}]} {
    %c0 = arith.constant 0 : index
    %c0_0 = arith.constant 0 : index
    %c0_1 = arith.constant 0 : index
    %0 = vector.load %arg1[%c0, %c0_0, %c0_1] : memref<1x16x256xf32, #tpu.memory_space<vmem>>, vector<1x16x256xf32>
    %1 = vector.shape_cast %0 : vector<1x16x256xf32> to vector<16x256xf32>
    %2 = arith.truncf %1 : vector<16x256xf32> to vector<16x256xbf16>
    %c0_2 = arith.constant 0 : index
    %c0_3 = arith.constant 0 : index
    %3 = vector.load %arg2[%c0_2, %c0_3] : memref<8x16xbf16, #tpu.memory_space<vmem>>, vector<8x16xbf16>
    %cst = arith.constant dense<0.000000e+00> : vector<8x256xf32>
    %4 = tpu.matmul %3, %2, %cst {dimension_numbers = #tpu.dot_dimension_numbers<[1], [0], [0], [1], [0, 0, 1, 1], [], []>} : vector<8x16xbf16>, vector<16x256xbf16>, vector<8x256xf32> -> vector<8x256xf32>
    %c0_4 = arith.constant 0 : index
    %c0_5 = arith.constant 0 : index
    %5 = vector.load %arg3[%c0_4, %c0_5] : memref<8x1xf32, #tpu.memory_space<vmem>>, vector<8x1xf32>
    %6 = vector.broadcast %5 : vector<8x1xf32> to vector<8x256xf32>
    %7 = arith.addf %4, %6 : vector<8x256xf32>
    %8 = tpu.iota {dimensions = array<i32: 1>} : vector<1x256xi32>
    %c16_i32 = arith.constant 16 : i32
    %9 = vector.broadcast %c16_i32 : i32 to vector<1x256xi32>
    %10 = arith.cmpi sge, %8, %9 : vector<1x256xi32>
    %11 = arith.extui %10 : vector<1x256xi1> to vector<1x256xi32>
    %12 = arith.sitofp %11 : vector<1x256xi32> to vector<1x256xf32>
    %c240_i32 = arith.constant 240 : i32
    %13 = vector.broadcast %c240_i32 : i32 to vector<1x256xi32>
    %14 = arith.cmpi slt, %8, %13 : vector<1x256xi32>
    %15 = arith.extui %14 : vector<1x256xi1> to vector<1x256xi32>
    %16 = arith.sitofp %15 : vector<1x256xi32> to vector<1x256xf32>
    %c0_6 = arith.constant 0 : index
    %c0_7 = arith.constant 0 : index
    %17 = vector.load %arg6[%c0_6, %c0_7] : memref<2x256xf32, #tpu.memory_space<vmem>>, vector<1x256xf32>
    %c1 = arith.constant 1 : index
    %c0_8 = arith.constant 0 : index
    %18 = vector.load %arg6[%c1, %c0_8] : memref<2x256xf32, #tpu.memory_space<vmem>>, vector<1x256xf32>
    %c17_i32 = arith.constant 17 : i32
    %19 = tpu.dynamic_rotate %7 by %c17_i32 dim 1 : vector<8x256xf32>, i32 -> vector<8x256xf32>
    %20 = arith.mulf %12, %17 : vector<1x256xf32>
    %21 = vector.broadcast %20 : vector<1x256xf32> to vector<8x256xf32>
    %22 = arith.mulf %19, %21 : vector<8x256xf32>
    %c0_9 = arith.constant 0 : index
    %c0_10 = arith.constant 0 : index
    %23 = vector.load %arg9[%c0_9, %c0_10] : memref<72x256xf32, #tpu.memory_space<vmem>>, vector<8x256xf32>
    tpu.vector_store %arg9[%c0_9, %c0_10], %22 {strides = array<i32>} : memref<72x256xf32, #tpu.memory_space<vmem>>, vector<8x256xf32>,
    %c16_i32_11 = arith.constant 16 : i32
    %24 = tpu.dynamic_rotate %7 by %c16_i32_11 dim 1 : vector<8x256xf32>, i32 -> vector<8x256xf32>
    %25 = vector.broadcast %12 : vector<1x256xf32> to vector<8x256xf32>
    %26 = arith.mulf %24, %25 : vector<8x256xf32>
    %c8 = arith.constant 8 : index
    %c0_12 = arith.constant 0 : index
    %27 = vector.load %arg9[%c8, %c0_12] : memref<72x256xf32, #tpu.memory_space<vmem>>, vector<8x256xf32>
    tpu.vector_store %arg9[%c8, %c0_12], %26 {strides = array<i32>} : memref<72x256xf32, #tpu.memory_space<vmem>>, vector<8x256xf32>,
    %c15_i32 = arith.constant 15 : i32
    %28 = tpu.dynamic_rotate %7 by %c15_i32 dim 1 : vector<8x256xf32>, i32 -> vector<8x256xf32>
    %29 = arith.mulf %12, %18 : vector<1x256xf32>
    %30 = vector.broadcast %29 : vector<1x256xf32> to vector<8x256xf32>
    %31 = arith.mulf %28, %30 : vector<8x256xf32>
    %c16 = arith.constant 16 : index
    %c0_13 = arith.constant 0 : index
    %32 = vector.load %arg9[%c16, %c0_13] : memref<72x256xf32, #tpu.memory_space<vmem>>, vector<8x256xf32>
    tpu.vector_store %arg9[%c16, %c0_13], %31 {strides = array<i32>} : memref<72x256xf32, #tpu.memory_space<vmem>>, vector<8x256xf32>,
    %c1_i32 = arith.constant 1 : i32
    %33 = tpu.dynamic_rotate %7 by %c1_i32 dim 1 : vector<8x256xf32>, i32 -> vector<8x256xf32>
    %34 = vector.broadcast %17 : vector<1x256xf32> to vector<8x256xf32>
    %35 = arith.mulf %33, %34 : vector<8x256xf32>
    %c24 = arith.constant 24 : index
    %c0_14 = arith.constant 0 : index
    %36 = vector.load %arg9[%c24, %c0_14] : memref<72x256xf32, #tpu.memory_space<vmem>>, vector<8x256xf32>
    tpu.vector_store %arg9[%c24, %c0_14], %35 {strides = array<i32>} : memref<72x256xf32, #tpu.memory_space<vmem>>, vector<8x256xf32>,
    %c32 = arith.constant 32 : index
    %c0_15 = arith.constant 0 : index
    %37 = vector.load %arg9[%c32, %c0_15] : memref<72x256xf32, #tpu.memory_space<vmem>>, vector<8x256xf32>
    tpu.vector_store %arg9[%c32, %c0_15], %7 {strides = array<i32>} : memref<72x256xf32, #tpu.memory_space<vmem>>, vector<8x256xf32>,
    %c255_i32 = arith.constant 255 : i32
    %38 = tpu.dynamic_rotate %7 by %c255_i32 dim 1 : vector<8x256xf32>, i32 -> vector<8x256xf32>
    %39 = vector.broadcast %18 : vector<1x256xf32> to vector<8x256xf32>
    %40 = arith.mulf %38, %39 : vector<8x256xf32>
    %c40 = arith.constant 40 : index
    %c0_16 = arith.constant 0 : index
    %41 = vector.load %arg9[%c40, %c0_16] : memref<72x256xf32, #tpu.memory_space<vmem>>, vector<8x256xf32>
    tpu.vector_store %arg9[%c40, %c0_16], %40 {strides = array<i32>} : memref<72x256xf32, #tpu.memory_space<vmem>>, vector<8x256xf32>,
    %c241_i32 = arith.constant 241 : i32
    %42 = tpu.dynamic_rotate %7 by %c241_i32 dim 1 : vector<8x256xf32>, i32 -> vector<8x256xf32>
    %43 = arith.mulf %16, %17 : vector<1x256xf32>
    %44 = vector.broadcast %43 : vector<1x256xf32> to vector<8x256xf32>
    %45 = arith.mulf %42, %44 : vector<8x256xf32>
    %c48 = arith.constant 48 : index
    %c0_17 = arith.constant 0 : index
    %46 = vector.load %arg9[%c48, %c0_17] : memref<72x256xf32, #tpu.memory_space<vmem>>, vector<8x256xf32>
    tpu.vector_store %arg9[%c48, %c0_17], %45 {strides = array<i32>} : memref<72x256xf32, #tpu.memory_space<vmem>>, vector<8x256xf32>,
    %c240_i32_18 = arith.constant 240 : i32
    %47 = tpu.dynamic_rotate %7 by %c240_i32_18 dim 1 : vector<8x256xf32>, i32 -> vector<8x256xf32>
    %48 = vector.broadcast %16 : vector<1x256xf32> to vector<8x256xf32>
    %49 = arith.mulf %47, %48 : vector<8x256xf32>
    %c56 = arith.constant 56 : index
    %c0_19 = arith.constant 0 : index
    %50 = vector.load %arg9[%c56, %c0_19] : memref<72x256xf32, #tpu.memory_space<vmem>>, vector<8x256xf32>
    tpu.vector_store %arg9[%c56, %c0_19], %49 {strides = array<i32>} : memref<72x256xf32, #tpu.memory_space<vmem>>, vector<8x256xf32>,
    %c239_i32 = arith.constant 239 : i32
    %51 = tpu.dynamic_rotate %7 by %c239_i32 dim 1 : vector<8x256xf32>, i32 -> vector<8x256xf32>
    %52 = arith.mulf %16, %18 : vector<1x256xf32>
    %53 = vector.broadcast %52 : vector<1x256xf32> to vector<8x256xf32>
    %54 = arith.mulf %51, %53 : vector<8x256xf32>
    %c64 = arith.constant 64 : index
    %c0_20 = arith.constant 0 : index
    %55 = vector.load %arg9[%c64, %c0_20] : memref<72x256xf32, #tpu.memory_space<vmem>>, vector<8x256xf32>
    tpu.vector_store %arg9[%c64, %c0_20], %54 {strides = array<i32>} : memref<72x256xf32, #tpu.memory_space<vmem>>, vector<8x256xf32>,
    %c0_21 = arith.constant 0 : index
    %c0_22 = arith.constant 0 : index
    %56 = vector.load %arg4[%c0_21, %c0_22] : memref<16x72xbf16, #tpu.memory_space<vmem>>, vector<16x72xbf16>
    %c0_23 = arith.constant 0 : index
    %c0_24 = arith.constant 0 : index
    %57 = vector.load %arg9[%c0_23, %c0_24] : memref<72x256xf32, #tpu.memory_space<vmem>>, vector<72x256xf32>
    %58 = arith.truncf %57 : vector<72x256xf32> to vector<72x256xbf16>
    %cst_25 = arith.constant dense<0.000000e+00> : vector<16x256xf32>
    %59 = tpu.matmul %56, %58, %cst_25 {dimension_numbers = #tpu.dot_dimension_numbers<[1], [0], [0], [1], [0, 0, 1, 1], [], []>} : vector<16x72xbf16>, vector<72x256xbf16>, vector<16x256xf32> -> vector<16x256xf32>
    %c0_26 = arith.constant 0 : index
    %c0_27 = arith.constant 0 : index
    %60 = vector.load %arg5[%c0_26, %c0_27] : memref<16x1xf32, #tpu.memory_space<vmem>>, vector<16x1xf32>
    %61 = vector.broadcast %60 : vector<16x1xf32> to vector<16x256xf32>
    %62 = arith.addf %59, %61 : vector<16x256xf32>
    %cst_28 = arith.constant dense<0.000000e+00> : vector<16xf32>
    %63 = vector.multi_reduction <add>, %62, %cst_28 [1] : vector<16x256xf32> to vector<16xf32>
    %64 = vector.shape_cast %63 : vector<16xf32> to vector<16x1xf32>
    %c0_29 = arith.constant 0 : index
    %c0_30 = arith.constant 0 : index
    %c0_31 = arith.constant 0 : index
    %65 = vector.load %arg8[%c0_29, %c0_30, %c0_31] : memref<1x16x2xf32, #tpu.memory_space<vmem>>, vector<1x16x1xf32>
    %66 = vector.shape_cast %65 : vector<1x16x1xf32> to vector<16x1xf32>
    %67 = vector.shape_cast %64 : vector<16x1xf32> to vector<1x16x1xf32>
    tpu.vector_store %arg8[%c0_29, %c0_30, %c0_31], %67 {strides = array<i32>} : memref<1x16x2xf32, #tpu.memory_space<vmem>>, vector<1x16x1xf32>,
    %68 = arith.mulf %62, %62 : vector<16x256xf32>
    %cst_32 = arith.constant dense<0.000000e+00> : vector<16xf32>
    %69 = vector.multi_reduction <add>, %68, %cst_32 [1] : vector<16x256xf32> to vector<16xf32>
    %70 = vector.shape_cast %69 : vector<16xf32> to vector<16x1xf32>
    %c0_33 = arith.constant 0 : index
    %c0_34 = arith.constant 0 : index
    %c1_35 = arith.constant 1 : index
    %71 = vector.load %arg8[%c0_33, %c0_34, %c1_35] : memref<1x16x2xf32, #tpu.memory_space<vmem>>, vector<1x16x1xf32>
    %72 = vector.shape_cast %71 : vector<1x16x1xf32> to vector<16x1xf32>
    %73 = vector.shape_cast %70 : vector<16x1xf32> to vector<1x16x1xf32>
    tpu.vector_store %arg8[%c0_33, %c0_34, %c1_35], %73 {strides = array<i32>} : memref<1x16x2xf32, #tpu.memory_space<vmem>>, vector<1x16x1xf32>,
    %74 = arith.truncf %62 : vector<16x256xf32> to vector<16x256xbf16>
    %c0_36 = arith.constant 0 : index
    %c0_37 = arith.constant 0 : index
    %c0_38 = arith.constant 0 : index
    %75 = vector.load %arg7[%c0_36, %c0_37, %c0_38] : memref<1x16x256xbf16, #tpu.memory_space<vmem>>, vector<1x16x256xbf16>
    %76 = vector.shape_cast %75 : vector<1x16x256xbf16> to vector<16x256xbf16>
    %77 = vector.shape_cast %74 : vector<16x256xbf16> to vector<1x16x256xbf16>
    tpu.vector_store %arg7[%c0_36, %c0_37, %c0_38], %77 {strides = array<i32>} : memref<1x16x256xbf16, #tpu.memory_space<vmem>>, vector<1x16x256xbf16>,
    return
  }
  func.func @transform_0(%arg0: i32) -> (i32, i32, i32) {
    %c0_i32 = arith.constant 0 : i32
    %c0_i32_0 = arith.constant 0 : i32
    %c0_i32_1 = arith.constant 0 : i32
    return %arg0, %c0_i32, %c0_i32_0 : i32, i32, i32
  }
  func.func @transform_1(%arg0: i32) -> (i32, i32) {
    %c0_i32 = arith.constant 0 : i32
    %c0_i32_0 = arith.constant 0 : i32
    %c0_i32_1 = arith.constant 0 : i32
    return %c0_i32, %c0_i32_0 : i32, i32
  }
  func.func @transform_2(%arg0: i32) -> (i32, i32) {
    %c0_i32 = arith.constant 0 : i32
    %c0_i32_0 = arith.constant 0 : i32
    %c0_i32_1 = arith.constant 0 : i32
    return %c0_i32, %c0_i32_0 : i32, i32
  }
  func.func @transform_3(%arg0: i32) -> (i32, i32) {
    %c0_i32 = arith.constant 0 : i32
    %c0_i32_0 = arith.constant 0 : i32
    %c0_i32_1 = arith.constant 0 : i32
    return %c0_i32, %c0_i32_0 : i32, i32
  }
  func.func @transform_4(%arg0: i32) -> (i32, i32) {
    %c0_i32 = arith.constant 0 : i32
    %c0_i32_0 = arith.constant 0 : i32
    %c0_i32_1 = arith.constant 0 : i32
    return %c0_i32, %c0_i32_0 : i32, i32
  }
  func.func @transform_5(%arg0: i32) -> (i32, i32) {
    %c0_i32 = arith.constant 0 : i32
    %c0_i32_0 = arith.constant 0 : i32
    %c0_i32_1 = arith.constant 0 : i32
    return %c0_i32, %c0_i32_0 : i32, i32
  }
  func.func @transform_6(%arg0: i32) -> (i32, i32, i32) {
    %c0_i32 = arith.constant 0 : i32
    %c0_i32_0 = arith.constant 0 : i32
    %c0_i32_1 = arith.constant 0 : i32
    return %arg0, %c0_i32, %c0_i32_0 : i32, i32, i32
  }
  func.func @transform_7(%arg0: i32) -> (i32, i32, i32) {
    %c0_i32 = arith.constant 0 : i32
    %c0_i32_0 = arith.constant 0 : i32
    %c0_i32_1 = arith.constant 0 : i32
    return %arg0, %c0_i32, %c0_i32_0 : i32, i32, i32
  }
}

</mosaic_0001>

<bundles_post_ra>
// kernel: tpu_custom_call.1
= control target key start
LH: loop header
LB: loop body
LE: loop exit
PB: predicated region body
PF: predicated region fallthrough
CT: control target
= control target key end

     0   :  { %13 = vsyncpa [#allocation4], 0  ;;  %s1288_s0 = inlined_call_operand.hbm [shape: f32[2,16,256], index: 0, kind: input, shape index: {}]   ;;  %s1289_s1 = inlined_call_operand.vmem [shape: bf16[8,16], index: 1, kind: input, shape index: {}]   ;;  %s1290_s2 = inlined_call_operand.vmem [shape: f32[8,1], index: 2, kind: input, shape index: {}]   ;;  %s1291_s3 = inlined_call_operand.vmem [shape: bf16[16,72], index: 3, kind: input, shape index: {}]   ;;  %s1292_s4 = inlined_call_operand.vmem [shape: f32[16,1], index: 4, kind: input, shape index: {}]   ;;  %s1293_s5 = inlined_call_operand.vmem [shape: f32[2,256], index: 5, kind: input, shape index: {}]   ;;  %s1294_s6 = inlined_call_operand.hbm [shape: bf16[2,16,256], index: 6, kind: output, shape index: {0}]   ;;  %s1295_s7 = inlined_call_operand.vmem [shape: f32[2,16,2], index: 7, kind: output, shape index: {1}]  }
   0x1   :  { %15 = vsyncpa [#allocation4 + $0x1], 0 }
   0x2   :  { %16 = vsyncpa [#allocation5], 0 }
   0x3   :  { %18 = vsyncpa [#allocation5 + $0x1], 0  ;;  %s1039_s24 = smov 0   ;;  %s1041_s25 = smov 0  }
   0x4   :  { %s1043_s26 = smov 0   ;;  %s1045_s27 = smov 0  }
   0x5 LB: > { %s1060_s28 = sadd.s32 4294967295, %s981_s27   ;;  %s796_s29 = sadd.s32 4294967294, %s981_s27   ;;  %s981_s27 = sphi %s1045_s27, %s1310_s27   ;;  %s977_s26 = sphi %s1043_s26, %s1309_s26   ;;  %s973_s25 = sphi %s1041_s25, %s1308_s25   ;;  %s969_s24 = sphi %s1039_s24, %s1307_s24  }
   0x6   : > { %s1064_s30 = sadd.s32 1, %s981_s27   ;;  %s31_s8 = sadd.s32 1, %s977_s26 }
   0x7   : > { %s28_s9 = ssub.s32 %s981_s27, %s1064_s30  ;;  %p38_p0 = scmp.ne.s32.totalorder %s977_s26, %s973_s25 }
   0x8   : > { %p29_p1 = scmp.eq.s32.totalorder %s28_s9, 0  ;;  %p39_p2 = scmp.eq.s32.totalorder %s981_s27, 0 }
   0x9   : > { %p44_p3 = scmp.ne.s32.totalorder %s973_s25, %s969_s24  ;;  %p45_p4 = scmp.eq.s32.totalorder %s1060_s28, 0 }
   0xa   : > { %s1076_s10 = scalar_select %p29_p1, %s977_s26, %s31_s8  }
   0xb   : > { %p1078_p5 = por %p39_p2, %p38_p0  ;;  %p1082_p6 = por %p45_p4, %p44_p3 }
   0xc   : > { %p173_p7 = scmp.eq.s32.totalorder %s1060_s28, 1  ;;  %p179_p8 = scmp.eq.s32.totalorder %s796_s29, 1 }
   0xd   : > { %s1299_s12 = scalar_select %p1082_p6, 1, 0 }
   0xe   : > { %p838_p10 = scmp.lt.s32.totalorder %s981_s27, 2  ;;  %p1089_p11 = por %p173_p7, %p38_p0 }
   0xf   : > { %p1093_p12 = por %p179_p8, %p44_p3  ;;  %s240_s15 = sand.u32 1, %s977_s26  }
  0x10   : > { %s1300_s13 = scalar_select %p1089_p11, 1, 0 }
  0x11   : > { %s1301_s14 = scalar_select %p1093_p12, 1, 0 }
  0x12   : > { %s821_s16 = sshll.u32 %s981_s27, 9  ;;  %s799_s17 = sshll.u32 %s240_s15, 5 }
  0x13   : > { %s1102_s20 = scalar_lea.hbm %s1288_s0, %s821_s16  ;;  %s244_s21 = scalar_lea.vmem [#allocation3], %s799_s17 }
  0x14   : > { %s251_s22 = sshll.u32 %s244_s21, 4  ;;  %p1106_p13 = pnand %p838_p10, %p1078_p5  ;;  %s1110_s22 = int_to_ptr.vmem [resolvable:$true] %s251_s22 }
  0x15   : > { %s1112_s29 = scalar_lea.sflag [#allocation4], %s240_s15  ;;  %s889_s8 = scalar_lea.hbm %s1102_s20, 512 }
  0x16   : > { %p890_p0 = scmp.ne.s32.totalorder %s1102_s20, %s889_s8  ;;  %p891_p1 = pneg %p1106_p13 }
  0x17   : > { %s894_s17 = scalar_lea.hbm %s1288_s0, 1024  ;;  %p895_p4 = scmp.lt.s32.totalorder %s1102_s20, %s1288_s0 }
  0x18   : > { %p892_p2 = pnand %p891_p1, %p890_p0  ;;  %p896_p5 = scmp.lt.s32.totalorder %s894_s17, %s889_s8 }
  0x1a   : > { %p893_p3 = pneg %p892_p2  ;;  %p897_p7 = por %p896_p5, %p895_p4 }
  0x1c   : > { %p898_p8 = pnand %p897_p7, %p893_p3 }
  0x1e   : > { %901 = shalt.err (!%p898_p8)
}
  0x1f   : > { %s902_s15 = scalar_lea.vmem %s1110_s22, 512  ;;  %s983_s19 = smov [#allocation3]  }
  0x20   : > { %p903_p10 = scmp.ne.s32.totalorder %s1110_s22, %s902_s15  ;;  %s907_s21 = sshll.u32 %s983_s19, 4  ;;  %s908_s21 = int_to_ptr.vmem [resolvable:$false] %s907_s21 }
  0x21   : > { %s909_s9 = scalar_lea.vmem %s908_s21, 1024  ;;  %p910_p2 = scmp.lt.s32.totalorder %s1110_s22, %s908_s21 }
  0x22   : > { %p905_p9 = pnand %p903_p10, %p891_p1  ;;  %p911_p12 = scmp.lt.s32.totalorder %s909_s9, %s902_s15 }
  0x24   : > { %p906_p0 = pneg %p905_p9  ;;  %p912_p11 = por %p911_p12, %p910_p2 }
  0x26   : > { %p913_p6 = pnand %p912_p11, %p906_p0 }
  0x28   : > { %916 = shalt.err (!%p913_p6)
}
  0x29   : > { %s984_s8 = smov 256   ;;  %s985_s16 = smov 16  }
  0x2a   : > { %833 = dma.hbm_to_vmem [thread:$0]  (!%p1106_p13), %s1102_s20, 512, %s1110_s22, %s1112_s29, %s984_s8, %s984_s8, %s985_s16  }
  0x2b   : > { %p802_p9 = scmp.ge.s32.totalorder %s981_s27, 1  ;;  %p259_p1 = scmp.lt.s32.totalorder %s981_s27, 3 }
  0x2d   : > { %p260_p3 = pnand %p802_p9, %p259_p1 }
  0x2e   : > { %s1136_s17 = sand.u32 (!%p260_p3), 1, %s973_s25   ;;  %p1303_p6 = scmp.ne.s32.totalorder (!%p260_p3), %s1299_s12, 0 }
  0x2f   : > { %263 = sbr.rel (%p260_p3) target bundleno = 752 (0x2f0), region = 44  ;;  %s803_s11 = sshll.u32 (!%p260_p3), %s1136_s17, 5 }
  0x30   : > { %s266_s18 = scalar_lea.sflag (!%p260_p3), [#allocation4], %s1136_s17  ;;  %s269_s15 = scalar_lea.vmem (!%p260_p3), [#allocation3], %s803_s11 }
  0x34   : > { %960 = dma.done.wait (%p1303_p6), %s266_s18, 512  }
  0x35   : > { %962 = vsyncadd (%p1303_p6), %s266_s18, 4294966784  ;;  %v986_v0 = vmov 0   ;;  %v312_v1 = vld [vmem:[%s269_s15 + $0x8] sm:$0xff]  ;;  %v314_v2 = vld [vmem:[%s269_s15 + $0x18] sm:$0xff]  ;;  %vm324_vm0 = vcmask 130048   ;;  %s987_s29 = smov 113   ;;  %v369_v18 = vlaneseq }
  0x36   : > { %360 = vmatprep.mubr.bf16.mxu0 %v986_v0  ;;  %886 = vset.pattern.permute.xlu0 %v986_v0  ;;  %v311_v3 = vld [vmem:[%s269_s15] sm:$0xff]  ;;  %v316_v4 = vpack.c.bf16 %v314_v2, %v312_v1  ;;  %v313_v5 = vld [vmem:[%s269_s15 + $0x10] sm:$0xff]  ;;  %s988_s19 = smov 111   ;;  %s989_s21 = smov 112   ;;  %v570_v16 = vld [vmem:[%s1292_s4 + $0x8] sm:$0xff]  ;;  %v995_v30 = vmov 0.0  }
  0x37   : > { %629 = vmatprep.mubr.bf16.mxu1 %v986_v0  ;;  %887 = vset.pattern.permute.xlu1 %v986_v0  ;;  %v318_v6 = vld [vmem:[%s1290_s2] sm:$0xff]  ;;  %v315_v7 = vpack.c.bf16 %v313_v5, %v311_v3  ;;  %s990_s9 = smov 127   ;;  %s991_s8 = smov 15   ;;  %v1176_v19 = vand.u32 127, %v369_v18  ;;  %v396_v20 = vshrl.u32 %v369_v18, 7  ;;  %vm590_vm7 = vcmask 1043456  }
  0x38   : > { %321 = vperm.xlu0 %886, %v318_v6   ;;  %342 = vmatprep.subr.bf16.mxu0 %v316_v4  ;;  %v317_v8 = vld [vmem:[%s1289_s1] sm:$0xf]  ;;  %s992_s16 = smov 1   ;;  %s993_s11 = smov 17   ;;  %vm586_vm12 = vcmask 588800  }
  0x39   : > { %343 = vmatpush1.bf16.msra.mxu0 %v315_v7  ;;  %s994_s18 = smov 16   ;;  %v569_v17 = vld [vmem:[%s1292_s4] sm:$0xff]  ;;  %v371_v21 = vadd.s32 128, %v1176_v19  ;;  %v401_v23 = vsub.s32 1, %v396_v20  ;;  %v1187_v28 = vsub.s32 0, %v396_v20  ;;  %vm490_vm2 = vcmp.lt.s32.totalorder %v1176_v19, 113 }
  0x3a   : > { %v810_v22 = vld [vmem:[%s1293_s5 + $0x1] ss:$2 sm:$0x3]  ;;  %v384_v24 = vld [vmem:[%s1293_s5] ss:$2 sm:$0x3] }
  0x3b   : > { %vm379_vm1 = vcmp.lt.s32.totalorder %v371_v21, 240  ;;  %v1185_v25 = vrot.slane %v810_v22, %v401_v23  ;;  %v1189_v29 = vrot.slane %v384_v24, %v401_v23  ;;  %v441_v32 = vrot.slane %v810_v22, %v1187_v28  ;;  %s825_s15 = sshll.u32 %s1060_s28, 8  ;;  %s677_s23 = scalar_lea.sflag [#allocation5], %s1136_s17 }
  0x3c   : > { %807 = vmatmul.mubr.msk.bf16.vlgmr.msra.gmra.mxu0 %vm324_vm0, %v317_v8  ;;  %v809_v31 = vsel %vm379_vm1, 1.0, %v995_v30  ;;  %vm522_vm3 = vcmp.lt.s32.totalorder %v1176_v19, 111  ;;  %vm511_vm4 = vcmp.lt.s32.totalorder %v1176_v19, 112  ;;  %v398_v39 = vrot.slane %v384_v24, %v1187_v28  ;;  %s1240_s12 = scalar_lea.hbm %s1294_s6, %s825_s15  ;;  %p1304_p12 = scmp.ne.s32.totalorder %s1300_s13, 0 }
  0x3d   : > { %v526_v33 = vmul.f32 %v809_v31, %v1185_v25  ;;  %v494_v35 = vmul.f32 %v809_v31, %v1189_v29  ;;  %v530_v37 = vrot.slane %v441_v32, %v1187_v28  ;;  %vm372_vm5 = vcmp.ge.s32.totalorder %v1176_v19, 16 }
  0x3e   : > { %vm479_vm6 = vcmp.lt.s32.totalorder %v1176_v19, 127  ;;  %v808_v50 = vsel %vm372_vm5, 1.0, %v995_v30  ;;  %v498_v51 = vrot.slane %v398_v39, %v1187_v28  ;;  %vm434_vm8 = vcmp.lt.s32.totalorder %v1176_v19, 15 }
  0x3f   : > { %v534_v38 = vrot.slane %v526_v33, %v1187_v28  ;;  %v502_v40 = vrot.slane %v494_v35, %v1187_v28  ;;  %v448_v60 = vmul.f32 %v808_v50, %v441_v32  ;;  %v457_v7 = vrot.slane %v1185_v25, %v1187_v28 }
  0x40   : > { %vm466_vm9 = vcmp.lt.s32.totalorder %v1176_v19, 1  ;;  %vm391_vm10 = vcmp.lt.s32.totalorder %v1176_v19, 17  ;;  %v414_v24 = vrot.slane %v1189_v29, %v1187_v28  ;;  %vm423_vm11 = vcmp.lt.s32.totalorder %v1176_v19, 16 }
  0x41   : > { %v453_v6 = vrot.slane %v448_v60, %v1187_v28 }
  0xb3   : > { %v322_v9 = vpop.permute.xlu0 %321 }
  0xfc   : > { %v362_v10 = vpop.f32.mrf.mxu0 }
  0xfd   : > { %v1150_v11 = vadd.f32 %v362_v10, %v322_v9 }
  0xfe   : > { %v364_v12 = vpop.f32.mrf.mxu0 }
  0xff   : > { %486 = vrot.lane.b32.xlu1 %v1150_v11, %s987_s29  ;;  %518 = vrot.lane.b32.xlu0 %v1150_v11, %s988_s19  ;;  %v1154_v14 = vadd.f32 %v364_v12, %v322_v9 }
 0x100   : > { %v366_v13 = vpop.f32.mrf.mxu0 }
 0x102   : > { %v367_v15 = vpop.f32.mrf.mxu0 }
 0x103   : > { %507 = vrot.lane.b32.xlu1 %v1150_v11, %s989_s21  ;;  %488 = vrot.lane.b32.xlu0 %v1154_v14, %s987_s29  ;;  %v405_v15 = vmul.f32 %v808_v50, %v398_v39 }
 0x107   : > { %520 = vrot.lane.b32.xlu1 %v1154_v14, %s988_s19  ;;  %509 = vrot.lane.b32.xlu0 %v1154_v14, %s989_s21  ;;  %s996_s19 = smov [#allocation6]  }
 0x108   : > { %s921_s21 = sshll.u32 %s996_s19, 4  ;;  %s922_s21 = int_to_ptr.vmem [resolvable:$false] %s921_s21 }
 0x10b   : > { %475 = vrot.lane.b32.xlu1 %v1150_v11, %s990_s9  ;;  %477 = vrot.lane.b32.xlu0 %v1154_v14, %s990_s9  ;;  %s923_s9 = scalar_lea.vmem %s922_s21, 512 }
 0x10f   : > { %430 = vrot.lane.b32.xlu1 %v1150_v11, %s991_s8  ;;  %432 = vrot.lane.b32.xlu0 %v1154_v14, %s991_s8 }
 0x113   : > { %462 = vrot.lane.b32.xlu1 %v1150_v11, %s992_s16  ;;  %464 = vrot.lane.b32.xlu0 %v1154_v14, %s992_s16  ;;  %s804_s16 = sshll.u32 %s1136_s17, 4 }
 0x117   : > { %387 = vrot.lane.b32.xlu1 %v1150_v11, %s993_s11  ;;  %389 = vrot.lane.b32.xlu0 %v1154_v14, %s993_s11  ;;  %s297_s11 = scalar_lea.vmem [#allocation6], %s804_s16 }
 0x11b   : > { %419 = vrot.lane.b32.xlu1 %v1150_v11, %s994_s18  ;;  %421 = vrot.lane.b32.xlu0 %v1154_v14, %s994_s18  ;;  %s695_s18 = sshll.u32 %s297_s11, 4  ;;  %s1234_s18 = int_to_ptr.vmem [resolvable:$true] %s695_s18 }
 0x11c   : > { %s917_s29 = scalar_lea.vmem %s1234_s18, 256  ;;  %p924_p5 = scmp.lt.s32.totalorder %s1234_s18, %s922_s21 }
 0x11d   : > { %p918_p11 = scmp.ne.s32.totalorder %s1234_s18, %s917_s29  ;;  %p925_p7 = scmp.lt.s32.totalorder %s923_s9, %s917_s29 }
 0x11f   : > { %578 = vperm.xlu0 %886, %v570_v16   ;;  %573 = vperm.xlu1 %887, %v569_v17   ;;  %p919_p13 = pnand %p918_p11, %p1304_p12  ;;  %p926_p8 = por %p925_p7, %p924_p5 }
 0x121   : > { %p920_p4 = pneg %p919_p13 }
 0x123   : > { %p927_p10 = pnand %p926_p8, %p920_p4 }
 0x171   : > { %v487_v26 = vpop.permute.xlu1 %486  ;;  %v519_v27 = vpop.permute.xlu0 %518 }
 0x175   : > { %v508_v34 = vpop.permute.xlu1 %507  ;;  %v489_v36 = vpop.permute.xlu0 %488 }
 0x176   : > { %v492_v43 = vsel %vm490_vm2, %v489_v36, %v487_v26  ;;  %v491_v52 = vsel %vm490_vm2, %v487_v26, %v489_v36 }
 0x177   : > { %v504_v53 = vmul.f32 %v502_v40, %v492_v43  ;;  %v503_v1 = vmul.f32 %v498_v51, %v491_v52 }
 0x179   : > { %v521_v41 = vpop.permute.xlu1 %520  ;;  %v510_v42 = vpop.permute.xlu0 %509 }
 0x17a   : > { %v523_v44 = vsel %vm522_vm3, %v519_v27, %v521_v41  ;;  %v524_v45 = vsel %vm522_vm3, %v521_v41, %v519_v27  ;;  %v513_v46 = vsel %vm511_vm4, %v510_v42, %v508_v34  ;;  %v512_v58 = vsel %vm511_vm4, %v508_v34, %v510_v42 }
 0x17b   : > { %v535_v47 = vmul.f32 %v530_v37, %v523_v44  ;;  %v515_v48 = vmul.f32 %v809_v31, %v513_v46  ;;  %v536_v49 = vmul.f32 %v534_v38, %v524_v45  ;;  %v565_v4 = vpack.c.bf16 %v512_v58, %v503_v1 }
 0x17c   : > { %v410_v31 = vrot.slane %v405_v15, %v1187_v28  ;;  %v888_v28 = vld [vmem:[%s1291_s3] sm:$0xff]  }
 0x17d   : > { %v476_v54 = vpop.permute.xlu1 %475  ;;  %v478_v55 = vpop.permute.xlu0 %477  ;;  %v568_v56 = vpack.c.bf16 %v536_v49, %v536_v49  ;;  %v567_v57 = vpack.c.bf16 %v535_v47, %v535_v47  ;;  %v566_v0 = vpack.c.bf16 %v515_v48, %v504_v53 }
 0x17e   : > { %v481_v59 = vsel %vm479_vm6, %v478_v55, %v476_v54  ;;  %v480_v61 = vsel %vm479_vm6, %v476_v54, %v478_v55 }
 0x17f   : > { %v483_v62 = vmul.f32 %v481_v59, %v1185_v25  ;;  %812 = vmatprep.subr.msk.bf16.mxu1 %vm590_vm7, %v568_v56  ;;  %v592_v63 = vsel %vm590_vm7, %v567_v57, 0  ;;  %v482_v5 = vmul.f32 %v480_v61, %v441_v32 }
 0x180   : > { %604 = vmatpush1.bf16.msra.mxu1 %v592_v63 }
 0x181   : > { %v431_v2 = vpop.permute.xlu1 %430  ;;  %605 = vmatprep.subr.bf16.mxu1 %v566_v0  ;;  %v433_v3 = vpop.permute.xlu0 %432  ;;  %v564_v8 = vpack.c.bf16 %v483_v62, %v1154_v14  ;;  %v563_v18 = vpack.c.bf16 %v482_v5, %v1150_v11 }
 0x182   : > { %v435_v9 = vsel %vm434_vm8, %v431_v2, %v433_v3  ;;  %v436_v10 = vsel %vm434_vm8, %v433_v3, %v431_v2 }
 0x183   : > { %v458_v20 = vmul.f32 %v453_v6, %v436_v10  ;;  %v459_v21 = vmul.f32 %v457_v7, %v435_v9 }
 0x184   : > { %606 = vmatpush1.bf16.msra.mxu1 %v565_v4 }
 0x185   : > { %v463_v12 = vpop.permute.xlu1 %462  ;;  %607 = vmatprep.subr.bf16.mxu1 %v564_v8  ;;  %v465_v13 = vpop.permute.xlu0 %464 }
 0x186   : > { %v467_v16 = vsel %vm466_vm9, %v463_v12, %v465_v13  ;;  %v468_v17 = vsel %vm466_vm9, %v465_v13, %v463_v12 }
 0x187   : > { %v469_v22 = vmul.f32 %v468_v17, %v398_v39  ;;  %v470_v14 = vmul.f32 %v467_v16, %v1189_v29 }
 0x188   : > { %608 = vmatpush1.bf16.msra.mxu1 %v563_v18 }
 0x189   : > { %v388_v23 = vpop.permute.xlu1 %387  ;;  %v390_v25 = vpop.permute.xlu0 %389  ;;  %v562_v26 = vpack.c.bf16 %v470_v14, %v459_v21  ;;  %v561_v27 = vpack.c.bf16 %v469_v22, %v458_v20 }
 0x18a   : > { %v392_v30 = vsel %vm391_vm10, %v388_v23, %v390_v25  ;;  %v393_v11 = vsel %vm391_vm10, %v390_v25, %v388_v23 }
 0x18b   : > { %609 = vmatprep.subr.bf16.mxu1 %v562_v26  ;;  %v416_v32 = vmul.f32 %v414_v24, %v392_v30  ;;  %v415_v37 = vmul.f32 %v410_v31, %v393_v11 }
 0x18c   : > { %610 = vmatpush1.bf16.msra.mxu1 %v561_v27 }
 0x18d   : > { %v420_v33 = vpop.permute.xlu1 %419  ;;  %v422_v34 = vpop.permute.xlu0 %421 }
 0x18e   : > { %v424_v35 = vsel %vm423_vm11, %v420_v33, %v422_v34  ;;  %v425_v36 = vsel %vm423_vm11, %v422_v34, %v420_v33 }
 0x18f   : > { %v426_v38 = vmul.f32 %v808_v50, %v425_v36  ;;  %v560_v29 = vpack.c.bf16 %v424_v35, %v416_v32 }
 0x191   : > { %611 = vmatprep.subr.bf16.mxu1 %v560_v29  ;;  %v559_v39 = vpack.c.bf16 %v426_v38, %v415_v37 }
 0x193   : > { %612 = vmatpush1.bf16.msra.mxu1 %v559_v39 }
 0x196   : > { %813 = vmatmul.mubr.msk.bf16.vlgmr.msra.gmra.mxu1 %vm586_vm12, %v888_v28 }
 0x19a   : > { %v574_v19 = vpop.permute.xlu1 %573  ;;  %v579_v44 = vpop.permute.xlu0 %578 }
 0x256   : > { %v631_v40 = vpop.f32.mrf.mxu1 }
 0x257   : > { %v632_v42 = vadd.f32 %v631_v40, %v574_v19 }
 0x258   : > { %v633_v41 = vpop.f32.mrf.mxu1 }
 0x259   : > { %v634_v43 = vadd.f32 %v633_v41, %v574_v19  ;;  %v649_v57 = vmul.f32 %v632_v42, %v632_v42 }
 0x25a   : > { %v635_v45 = vpop.f32.mrf.mxu1 }
 0x25b   : > { %v823_v46 = vpack.c.bf16 %v634_v43, %v632_v42  ;;  %v636_v47 = vadd.f32 %v635_v45, %v579_v44  ;;  %v640_v48 = vadd.f32 %v634_v43, %v632_v42  ;;  %v650_v51 = vmul.f32 %v634_v43, %v634_v43 }
 0x25c   : > { %v637_v49 = vpop.f32.mrf.mxu1 }
 0x25d   : > { %674 = vst [vmem:[%s297_s11] sm:$0xff] %v823_v46  ;;  %v638_v50 = vadd.f32 %v637_v49, %v579_v44  ;;  %641 = vadd.xlane.f32.xlu1 %v640_v48  ;;  %v651_v54 = vmul.f32 %v636_v47, %v636_v47  ;;  %v653_v58 = vadd.f32 %v650_v51, %v649_v57 }
 0x25f   : > { %v824_v52 = vpack.c.bf16 %v638_v50, %v636_v47  ;;  %v643_v53 = vadd.f32 %v638_v50, %v636_v47  ;;  %v652_v55 = vmul.f32 %v638_v50, %v638_v50 }
 0x261   : > { %675 = vst [vmem:[%s297_s11 + $0x8] sm:$0xff] %v824_v52  ;;  %644 = vadd.xlane.f32.xlu0 %v643_v53  ;;  %v656_v56 = vadd.f32 %v652_v55, %v651_v54 }
 0x263   : > { %657 = vadd.xlane.f32.xlu1 %v656_v56 }
 0x265   : > { %654 = vadd.xlane.f32.xlu0 %v653_v58 }
 0x266   : > { %930 = shalt.err (!%p927_p10)
}
 0x267   : > { %s931_s8 = scalar_lea.hbm %s1240_s12, 256  ;;  %s935_s15 = scalar_lea.hbm %s1294_s6, 512 }
 0x268   : > { %p932_p0 = scmp.ne.s32.totalorder %s1240_s12, %s931_s8  ;;  %p936_p1 = scmp.lt.s32.totalorder %s1240_s12, %s1294_s6 }
 0x269   : > { %p937_p3 = scmp.lt.s32.totalorder %s935_s15, %s931_s8 }
 0x26a   : > { %p933_p2 = pnand %p932_p0, %p1304_p12 }
 0x26b   : > { %p938_p6 = por %p937_p3, %p936_p1 }
 0x26c   : > { %p934_p9 = pneg %p933_p2 }
 0x26e   : > { %p939_p11 = pnand %p938_p6, %p934_p9 }
 0x270   : > { %942 = shalt.err (!%p939_p11)
}
 0x271   : > { %s997_s29 = smov 128   ;;  %s998_s19 = smov 8   ;;  %vm646_vm13 = vcmask 7168   ;;  %vm659_vm14 = vcmask 15368  }
 0x272   : > { %828 = dma.vmem_to_hbm [thread:$0]  (%p1304_p12), %s1234_s18, 256, %s1240_s12, %s677_s23, %s997_s29, %s997_s29, %s998_s19  }
 0x273   : > { %p305_p13 = scmp.lt.s32.totalorder %s1060_s28, 1 }
 0x275   : > { %s1312_s28 = smov (!%p305_p13, %s1060_s28), 1 }
 0x276   : > { %s822_s21 = sshll.u32 %s1312_s28, 4 }
 0x277   : > { %s309_s8 = scalar_lea.vmem %s1295_s7, %s822_s21 }
 0x2e6   : > { %v642_v59 = vpop.xlane.xlu1 %641 }
 0x2e7   : > { %647 = vst.msk [vmem:[%s309_s8] sm:$0xff] %vm646_vm13, %v642_v59 }
 0x2ea   : > { %v645_v60 = vpop.xlane.xlu0 %644 }
 0x2eb   : > { %648 = vst.msk [vmem:[%s309_s8 + $0x8] sm:$0xff] %vm646_vm13, %v645_v60 }
 0x2ec   : > { %v658_v61 = vpop.xlane.xlu1 %657 }
 0x2ed   : > { %661 = vst.msk [vmem:[%s309_s8 + $0x8] sm:$0xff] %vm659_vm14, %v658_v61 }
 0x2ee   : > { %v655_v62 = vpop.xlane.xlu0 %654 }
 0x2ef   : > { %660 = vst.msk [vmem:[%s309_s8] sm:$0xff] %vm659_vm14, %v655_v62 }
 0x2f0 PF: > { %s713_s13 = sand.u32 1, %s969_s24   ;;  %p1305_p12 = scmp.ne.s32.totalorder %s1301_s14, 0 }
 0x2f1   : > { %p1306_p4 = scmp.ge.s32.totalorder %s981_s27, 2  ;;  %s714_s28 = scalar_lea.sflag [#allocation5], %s713_s13 }
 0x2f3   : > { %p835_p5 = pnand %p1306_p4, %p1305_p12 }
 0x2f5   : > { %p836_p7 = pneg %p835_p5 }
 0x2f7   : > { %964 = dma.done.wait (%p836_p7), %s714_s28, 256  }
 0x2f8   : > { %966 = vsyncadd (%p836_p7), %s714_s28, 4294967040  ;;  %p21_p8 = scmp.ge.s32.totalorder %s1064_s30, 4   ;;  %s1307_s24 = smov %s973_s25 }
 0x2f9   : > { %s1308_s25 = smov %s977_s26  ;;  %s1309_s26 = smov %s1076_s10 }
 0x2fa   : > { %s1310_s27 = smov %s1064_s30  ;;  %23 = sbr.rel (!%p21_p8) target bundleno = 5 (0x5), region = 102 }
 0x2ff   :  { %727 = vsyncpa [#allocation4], 1 }
 0x300   :  { %729 = vsyncpa [#allocation4 + $0x1], 1 }
 0x301   :  { %730 = vsyncpa [#allocation5], 1 }
 0x302   :  { %732 = vsyncpa [#allocation5 + $0x1], 1 }

</bundles_post_ra>
